<compile_context>
chip_gen: v5e
topology: v5e:2x2
jax: 0.10.0
libtpu: 0.0.40
codegen_flags: <defaults>
</compile_context>

<pallas_src>
import functools

import jax
import jax.numpy as jnp
from jax.experimental import pallas as pl
from jax.experimental.pallas import tpu as pltpu

IN_DIM = 80
MID_LAYER = 32
LATENT_DIM = 80   # forced by decoder(x) in the reference forward (see note above)
MIN_SPLIT_ROWS = 2048  # split into >=2 tiles above this so both v7x TCs get work


def _round_up(n, m):
    return ((n + m - 1) // m) * m


def _choose_tiling(B, block_b):
    """Return (TB, B_pad). Avoid padding whenever possible."""
    if B <= block_b and B < MIN_SPLIT_ROWS:
        # Single tile: block equals the full batch dim, no 8-row constraint,
        # no padding, no post-kernel row trim.
        return B, B
    # Multiple tiles: tile rows must be a multiple of 8.
    n = max(-(-B // block_b), 2)            # cdiv, at least 2 tiles
    TB = _round_up(-(-B // n), 8)
    B_pad = n * TB                          # pads at most 8*n - 1 rows total
    return TB, B_pad


def _autoencoder_kernel(x_ref, w1_ref, b1_ref, w2e_ref, b2e_ref, w2d_ref, b2d_ref,
                        enc_ref, dec_ref):
    x = x_ref[...]                                                    # (TB, 80)

    # Fused first layers of encoder+decoder: h = relu(x @ [we1|wd1] + [be1|bd1])
    h = jnp.dot(x, w1_ref[...], preferred_element_type=jnp.float32,
                precision=jax.lax.Precision.HIGHEST) + b1_ref[...]
    h = jnp.maximum(h, 0.0)                                           # (TB, 2*mid)

    # Second layers: weights are row-zero-padded to consume the fused h directly,
    # producing exact-width outputs (no lane slicing, no post-kernel slab slice).
    s_enc = jnp.dot(h, w2e_ref[...], preferred_element_type=jnp.float32,
                    precision=jax.lax.Precision.HIGHEST) + b2e_ref[...]
    enc_ref[...] = jnp.maximum(s_enc, 0.0)                            # (TB, latent)

    s_dec = jnp.dot(h, w2d_ref[...], preferred_element_type=jnp.float32,
                    precision=jax.lax.Precision.HIGHEST) + b2d_ref[...]
    dec_ref[...] = jax.nn.sigmoid(s_dec)                              # (TB, 80)


def pack_params(p):
    """Pack torch-style per-layer weights. Call ONCE when weights are loaded."""
    mid = p["we1"].shape[1]
    latent = p["we2"].shape[1]
    # decoder(x) in the reference forward requires latent_dim == IN_DIM.
    assert latent == IN_DIM, "AutoEncoder.forward applies decoder to x; needs latent_dim == 80"
    assert p["wd1"].shape[0] == latent and p["wd2"].shape[1] == IN_DIM

    # First layer: concatenate encoder/decoder along output features.
    w1 = jnp.concatenate([p["we1"], p["wd1"]], axis=1)                # (80, 2*mid)
    b1 = jnp.concatenate([p["be1"], p["bd1"]], axis=1)                # (1, 2*mid)

    # Second layers: zero rows for the "other" half of the fused h.
    zeros = jnp.zeros((mid, IN_DIM), jnp.float32)
    w2e = jnp.concatenate([p["we2"], jnp.zeros((mid, latent), jnp.float32)], axis=0)  # (2*mid, latent)
    w2d = jnp.concatenate([zeros, p["wd2"]], axis=0)                  # (2*mid, 80)
    return dict(w1=w1, b1=b1, w2e=w2e, b2e=p["be2"], w2d=w2d, b2d=p["bd2"])


@functools.partial(jax.jit, static_argnames=("block_b",))
def autoencoder_forward(x, packed, block_b=4096):
    """x: [B, 80] float32. packed: output of pack_params.
    Returns (encoded [B, latent], decoded [B, 80])."""
    B = x.shape[0]
    assert x.shape[1] == IN_DIM
    latent = packed["w2e"].shape[1]
    mid2 = packed["w1"].shape[1]

    TB, B_pad = _choose_tiling(B, block_b)
    if B_pad != B:
        x = jnp.pad(x, ((0, B_pad - B), (0, 0)))

    grid = (B_pad // TB,)
    batch_map = lambda i: (i, 0)
    const_map = lambda i: (0, 0)

    in_specs = [
        # x: tiled along batch, double-buffered by the Pallas pipeline.
        pl.BlockSpec((TB, IN_DIM), batch_map),
        # Packed weights/biases: constant block index -> stay VMEM-resident
        # across grid steps (Mosaic skips the re-DMA for unchanged block idx).
        pl.BlockSpec(packed["w1"].shape, const_map),
        pl.BlockSpec(packed["b1"].shape, const_map),
        pl.BlockSpec(packed["w2e"].shape, const_map),
        pl.BlockSpec(packed["b2e"].shape, const_map),
        pl.BlockSpec(packed["w2d"].shape, const_map),
        pl.BlockSpec(packed["b2d"].shape, const_map),
    ]
    out_specs = (
        pl.BlockSpec((TB, latent), batch_map),
        pl.BlockSpec((TB, IN_DIM), batch_map),
    )
    out_shape = (
        jax.ShapeDtypeStruct((B_pad, latent), jnp.float32),
        jax.ShapeDtypeStruct((B_pad, IN_DIM), jnp.float32),
    )

    weight_bytes = 4 * sum(v.size for v in packed.values())
    cost = pl.CostEstimate(
        flops=2 * B_pad * (IN_DIM * mid2 + mid2 * (latent + IN_DIM)),
        transcendentals=B_pad * IN_DIM,                       # sigmoid exp
        bytes_accessed=4 * B_pad * (IN_DIM + latent + IN_DIM) + weight_bytes,
    )

    enc, dec = pl.pallas_call(
        _autoencoder_kernel,
        grid=grid,
        in_specs=in_specs,
        out_specs=out_specs,
        out_shape=out_shape,
        compiler_params=pltpu.CompilerParams(
            dimension_semantics=("parallel",),   # v7x: shard batch tiles over both TCs
        ),
        cost_estimate=cost,
    )(x, packed["w1"], packed["b1"], packed["w2e"], packed["b2e"],
      packed["w2d"], packed["b2d"])

    if B_pad != B:          # only copies when the batch was ragged
        enc = enc[:B]
        dec = dec[:B]
    return enc, dec


def init_params(key, mid_layer=MID_LAYER, latent_dim=LATENT_DIM):
    """Deterministic init mirroring nn.Linear's U(-1/sqrt(fan_in), 1/sqrt(fan_in))."""
    ks = jax.random.split(key, 8)

    def linear(kw, kb, fan_in, fan_out):
        bound = 1.0 / jnp.sqrt(jnp.float32(fan_in))
        w = jax.random.uniform(kw, (fan_in, fan_out), jnp.float32, -bound, bound)
        b = jax.random.uniform(kb, (1, fan_out), jnp.float32, -bound, bound)
        return w, b

    we1, be1 = linear(ks[0], ks[1], IN_DIM, mid_layer)
    we2, be2 = linear(ks[2], ks[3], mid_layer, latent_dim)
    wd1, bd1 = linear(ks[4], ks[5], latent_dim, mid_layer)
    wd2, bd2 = linear(ks[6], ks[7], mid_layer, IN_DIM)
    return dict(we1=we1, be1=be1, we2=we2, be2=be2,
                wd1=wd1, bd1=bd1, wd2=wd2, bd2=bd2)


def reference_forward(x, p):
    """Pure-JAX reference matching the PyTorch forward (f32 precision)."""
    hi = jax.lax.Precision.HIGHEST
    h = jnp.maximum(jnp.dot(x, p["we1"], precision=hi) + p["be1"], 0.0)
    enc = jnp.maximum(jnp.dot(h, p["we2"], precision=hi) + p["be2"], 0.0)
    hd = jnp.maximum(jnp.dot(x, p["wd1"], precision=hi) + p["bd1"], 0.0)
    dec = jax.nn.sigmoid(jnp.dot(hd, p["wd2"], precision=hi) + p["bd2"])
    return enc, dec


if __name__ == "__main__":
    key = jax.random.PRNGKey(0)
    k_params, k_x = jax.random.split(key)

    B = 8
    params = init_params(k_params)
    packed = pack_params(params)               # packed once, outside the jitted forward
    x = jax.random.uniform(k_x, (B, IN_DIM), jnp.float32)

    enc, dec = autoencoder_forward(x, packed)
    enc, dec = jax.block_until_ready((enc, dec))

    enc_ref, dec_ref = reference_forward(x, params)
    assert enc.shape == (B, LATENT_DIM) and dec.shape == (B, IN_DIM)
    assert jnp.allclose(enc, enc_ref, atol=1e-5, rtol=1e-5)
    assert jnp.allclose(dec, dec_ref, atol=1e-5, rtol=1e-5)

    # Also exercise the ragged / multi-tile (padded) batch path.
    B2 = 1000
    x2 = jax.random.uniform(jax.random.PRNGKey(1), (B2, IN_DIM), jnp.float32)
    enc2, dec2 = jax.block_until_ready(autoencoder_forward(x2, packed, block_b=256))
    enc2_ref, dec2_ref = reference_forward(x2, params)
    assert enc2.shape == (B2, LATENT_DIM) and dec2.shape == (B2, IN_DIM)
    assert jnp.allclose(enc2, enc2_ref, atol=1e-5, rtol=1e-5)
    assert jnp.allclose(dec2, dec2_ref, atol=1e-5, rtol=1e-5)

    print("KERNEL_OK")
</pallas_src>

<mosaic_0001>
module attributes {stable_mosaic.version = 11 : i64} {
  func.func @_autoencoder_kernel(%arg0: i32, %arg1: memref<8x80xf32, #tpu.memory_space<vmem>>, %arg2: memref<80x64xf32, #tpu.memory_space<vmem>>, %arg3: memref<1x64xf32, #tpu.memory_space<vmem>>, %arg4: memref<64x80xf32, #tpu.memory_space<vmem>>, %arg5: memref<1x80xf32, #tpu.memory_space<vmem>>, %arg6: memref<64x80xf32, #tpu.memory_space<vmem>>, %arg7: memref<1x80xf32, #tpu.memory_space<vmem>>, %arg8: memref<8x80xf32, #tpu.memory_space<vmem>>, %arg9: memref<8x80xf32, #tpu.memory_space<vmem>>) attributes {dimension_semantics = [#tpu.dimension_semantics<parallel>], iteration_bounds = array<i64: 1>, scalar_prefetch = 0 : i64, scratch_operands = 0 : i64, tpu.core_type = #tpu.core_type<tc>, window_params = [{transform_indices = @transform_0, window_bounds = array<i64: 8, 80>}, {pipeline_mode = #tpu.pipeline_mode<synchronous>, transform_indices = @transform_1, window_bounds = array<i64: 80, 64>}, {pipeline_mode = #tpu.pipeline_mode<synchronous>, transform_indices = @transform_2, window_bounds = array<i64: 1, 64>}, {pipeline_mode = #tpu.pipeline_mode<synchronous>, transform_indices = @transform_3, window_bounds = array<i64: 64, 80>}, {pipeline_mode = #tpu.pipeline_mode<synchronous>, transform_indices = @transform_4, window_bounds = array<i64: 1, 80>}, {pipeline_mode = #tpu.pipeline_mode<synchronous>, transform_indices = @transform_5, window_bounds = array<i64: 64, 80>}, {pipeline_mode = #tpu.pipeline_mode<synchronous>, transform_indices = @transform_6, window_bounds = array<i64: 1, 80>}, {transform_indices = @transform_7, window_bounds = array<i64: 8, 80>}, {transform_indices = @transform_8, window_bounds = array<i64: 8, 80>}]} {
    %c0 = arith.constant 0 : index
    %c0_0 = arith.constant 0 : index
    %0 = vector.load %arg1[%c0, %c0_0] : memref<8x80xf32, #tpu.memory_space<vmem>>, vector<8x80xf32>
    %c0_1 = arith.constant 0 : index
    %c0_2 = arith.constant 0 : index
    %1 = vector.load %arg2[%c0_1, %c0_2] : memref<80x64xf32, #tpu.memory_space<vmem>>, vector<80x64xf32>
    %cst = arith.constant dense<0.000000e+00> : vector<8x64xf32>
    %2 = tpu.matmul %0, %1, %cst {dimension_numbers = #tpu.dot_dimension_numbers<[1], [0], [0], [1], [0, 0, 1, 1], [], []>, precision = #tpu.contract_precision<fp32>} : vector<8x80xf32>, vector<80x64xf32>, vector<8x64xf32> -> vector<8x64xf32>
    %c0_3 = arith.constant 0 : index
    %c0_4 = arith.constant 0 : index
    %3 = vector.load %arg3[%c0_3, %c0_4] : memref<1x64xf32, #tpu.memory_space<vmem>>, vector<1x64xf32>
    %4 = vector.broadcast %3 : vector<1x64xf32> to vector<8x64xf32>
    %5 = arith.addf %2, %4 : vector<8x64xf32>
    %cst_5 = arith.constant 0.000000e+00 : f32
    %6 = vector.broadcast %cst_5 : f32 to vector<8x64xf32>
    %7 = arith.maximumf %5, %6 : vector<8x64xf32>
    %c0_6 = arith.constant 0 : index
    %c0_7 = arith.constant 0 : index
    %8 = vector.load %arg4[%c0_6, %c0_7] : memref<64x80xf32, #tpu.memory_space<vmem>>, vector<64x80xf32>
    %cst_8 = arith.constant dense<0.000000e+00> : vector<8x80xf32>
    %9 = tpu.matmul %7, %8, %cst_8 {dimension_numbers = #tpu.dot_dimension_numbers<[1], [0], [0], [1], [0, 0, 1, 1], [], []>, precision = #tpu.contract_precision<fp32>} : vector<8x64xf32>, vector<64x80xf32>, vector<8x80xf32> -> vector<8x80xf32>
    %c0_9 = arith.constant 0 : index
    %c0_10 = arith.constant 0 : index
    %10 = vector.load %arg5[%c0_9, %c0_10] : memref<1x80xf32, #tpu.memory_space<vmem>>, vector<1x80xf32>
    %11 = vector.broadcast %10 : vector<1x80xf32> to vector<8x80xf32>
    %12 = arith.addf %9, %11 : vector<8x80xf32>
    %cst_11 = arith.constant 0.000000e+00 : f32
    %13 = vector.broadcast %cst_11 : f32 to vector<8x80xf32>
    %14 = arith.maximumf %12, %13 : vector<8x80xf32>
    %c0_12 = arith.constant 0 : index
    %c0_13 = arith.constant 0 : index
    %15 = vector.load %arg8[%c0_12, %c0_13] : memref<8x80xf32, #tpu.memory_space<vmem>>, vector<8x80xf32>
    tpu.vector_store %arg8[%c0_12, %c0_13], %14 {strides = array<i32>} : memref<8x80xf32, #tpu.memory_space<vmem>>, vector<8x80xf32>,
    %c0_14 = arith.constant 0 : index
    %c0_15 = arith.constant 0 : index
    %16 = vector.load %arg6[%c0_14, %c0_15] : memref<64x80xf32, #tpu.memory_space<vmem>>, vector<64x80xf32>
    %cst_16 = arith.constant dense<0.000000e+00> : vector<8x80xf32>
    %17 = tpu.matmul %7, %16, %cst_16 {dimension_numbers = #tpu.dot_dimension_numbers<[1], [0], [0], [1], [0, 0, 1, 1], [], []>, precision = #tpu.contract_precision<fp32>} : vector<8x64xf32>, vector<64x80xf32>, vector<8x80xf32> -> vector<8x80xf32>
    %c0_17 = arith.constant 0 : index
    %c0_18 = arith.constant 0 : index
    %18 = vector.load %arg7[%c0_17, %c0_18] : memref<1x80xf32, #tpu.memory_space<vmem>>, vector<1x80xf32>
    %19 = vector.broadcast %18 : vector<1x80xf32> to vector<8x80xf32>
    %20 = arith.addf %17, %19 : vector<8x80xf32>
    %21 = arith.negf %20 : vector<8x80xf32>
    %22 = math.exp %21 : vector<8x80xf32>
    %cst_19 = arith.constant 1.000000e+00 : f32
    %23 = vector.broadcast %cst_19 : f32 to vector<8x80xf32>
    %24 = arith.addf %23, %22 : vector<8x80xf32>
    %25 = arith.divf %23, %24 : vector<8x80xf32>
    %c0_20 = arith.constant 0 : index
    %c0_21 = arith.constant 0 : index
    %26 = vector.load %arg9[%c0_20, %c0_21] : memref<8x80xf32, #tpu.memory_space<vmem>>, vector<8x80xf32>
    tpu.vector_store %arg9[%c0_20, %c0_21], %25 {strides = array<i32>} : memref<8x80xf32, #tpu.memory_space<vmem>>, vector<8x80xf32>,
    return
  }
  func.func @transform_0(%arg0: i32) -> (i32, i32) {
    %c0_i32 = arith.constant 0 : i32
    %c0_i32_0 = arith.constant 0 : i32
    return %arg0, %c0_i32 : i32, i32
  }
  func.func @transform_1(%arg0: i32) -> (i32, i32) {
    %c0_i32 = arith.constant 0 : i32
    %c0_i32_0 = arith.constant 0 : i32
    %c0_i32_1 = arith.constant 0 : i32
    return %c0_i32, %c0_i32_0 : i32, i32
  }
  func.func @transform_2(%arg0: i32) -> (i32, i32) {
    %c0_i32 = arith.constant 0 : i32
    %c0_i32_0 = arith.constant 0 : i32
    %c0_i32_1 = arith.constant 0 : i32
    return %c0_i32, %c0_i32_0 : i32, i32
  }
  func.func @transform_3(%arg0: i32) -> (i32, i32) {
    %c0_i32 = arith.constant 0 : i32
    %c0_i32_0 = arith.constant 0 : i32
    %c0_i32_1 = arith.constant 0 : i32
    return %c0_i32, %c0_i32_0 : i32, i32
  }
  func.func @transform_4(%arg0: i32) -> (i32, i32) {
    %c0_i32 = arith.constant 0 : i32
    %c0_i32_0 = arith.constant 0 : i32
    %c0_i32_1 = arith.constant 0 : i32
    return %c0_i32, %c0_i32_0 : i32, i32
  }
  func.func @transform_5(%arg0: i32) -> (i32, i32) {
    %c0_i32 = arith.constant 0 : i32
    %c0_i32_0 = arith.constant 0 : i32
    %c0_i32_1 = arith.constant 0 : i32
    return %c0_i32, %c0_i32_0 : i32, i32
  }
  func.func @transform_6(%arg0: i32) -> (i32, i32) {
    %c0_i32 = arith.constant 0 : i32
    %c0_i32_0 = arith.constant 0 : i32
    %c0_i32_1 = arith.constant 0 : i32
    return %c0_i32, %c0_i32_0 : i32, i32
  }
  func.func @transform_7(%arg0: i32) -> (i32, i32) {
    %c0_i32 = arith.constant 0 : i32
    %c0_i32_0 = arith.constant 0 : i32
    return %arg0, %c0_i32 : i32, i32
  }
  func.func @transform_8(%arg0: i32) -> (i32, i32) {
    %c0_i32 = arith.constant 0 : i32
    %c0_i32_0 = arith.constant 0 : i32
    return %arg0, %c0_i32 : i32, i32
  }
}

</mosaic_0001>

<bundles_post_ra>
// kernel: autoencoder_forward.1
= control target key start
LH: loop header
LB: loop body
LE: loop exit
PB: predicated region body
PF: predicated region fallthrough
CT: control target
= control target key end

     0   :  { %14 = vsyncpa [#allocation3], 0  ;;  %s1396_s0 = inlined_call_operand.vmem [shape: f32[8,80], index: 0, kind: input, shape index: {}]   ;;  %s1397_s1 = inlined_call_operand.vmem [shape: f32[80,64], index: 1, kind: input, shape index: {}]   ;;  %s1398_s2 = inlined_call_operand.vmem [shape: f32[1,64], index: 2, kind: input, shape index: {}]   ;;  %s1399_s3 = inlined_call_operand.vmem [shape: f32[64,80], index: 3, kind: input, shape index: {}]   ;;  %s1400_s4 = inlined_call_operand.vmem [shape: f32[1,80], index: 4, kind: input, shape index: {}]   ;;  %s1401_s5 = inlined_call_operand.vmem [shape: f32[64,80], index: 5, kind: input, shape index: {}]   ;;  %s1402_s6 = inlined_call_operand.vmem [shape: f32[1,80], index: 6, kind: input, shape index: {}]   ;;  %s1403_s7 = inlined_call_operand.hbm [shape: f32[8,80], index: 7, kind: output, shape index: {0}]   ;;  %s1404_s8 = inlined_call_operand.hbm [shape: f32[8,80], index: 8, kind: output, shape index: {1}]  }
   0x1   :  { %v40_v0 = vld [vmem:[%s1397_s1 + $0x48] sm:$0xff]  ;;  %v39_v1 = vld [vmem:[%s1397_s1 + $0x40] sm:$0xff]  ;;  %v38_v2 = vld [vmem:[%s1397_s1 + $0x38] sm:$0xff] }
   0x2   :  { %v987_v3 = vand.u32 4294901760, %v40_v0  ;;  %v989_v4 = vand.u32 4294901760, %v39_v1  ;;  %v991_v5 = vand.u32 4294901760, %v38_v2  ;;  %v37_v6 = vld [vmem:[%s1397_s1 + $0x30] sm:$0xff]  ;;  %v36_v7 = vld [vmem:[%s1397_s1 + $0x28] sm:$0xff]  ;;  %v35_v8 = vld [vmem:[%s1397_s1 + $0x20] sm:$0xff] }
   0x3   :  { %v1002_v9 = vand.u32 4294901760, %v37_v6  ;;  %v1004_v10 = vand.u32 4294901760, %v36_v7  ;;  %v1006_v11 = vand.u32 4294901760, %v35_v8  ;;  %v34_v12 = vld [vmem:[%s1397_s1 + $0x18] sm:$0xff]  ;;  %v33_v13 = vld [vmem:[%s1397_s1 + $0x10] sm:$0xff]  ;;  %v32_v22 = vld [vmem:[%s1397_s1 + $0x8] sm:$0xff] }
   0x4   :  { %56 = vmatpush.msra.mxu0 %v987_v3  ;;  %v1016_v14 = vsub.f32 %v40_v0, %v987_v3  ;;  %v1019_v15 = vsub.f32 %v39_v1, %v989_v4  ;;  %v1022_v16 = vsub.f32 %v38_v2, %v991_v5  ;;  %204 = vmatpush.msra.mxu3 %v987_v3  ;;  %v1025_v17 = vand.u32 4294901760, %v34_v12 }
   0x5   :  { %v1028_v18 = vsub.f32 %v37_v6, %v1002_v9  ;;  %v1031_v19 = vsub.f32 %v36_v7, %v1004_v10  ;;  %v1034_v20 = vsub.f32 %v35_v8, %v1006_v11  ;;  %v1036_v21 = vand.u32 4294901760, %v33_v13 }
   0x6   :  { %58 = vmatpush.msra.mxu0 %v989_v4  ;;  %v92_v23 = vand.u32 4294901760, %v1016_v14  ;;  %v98_v24 = vand.u32 4294901760, %v1019_v15  ;;  %v104_v25 = vand.u32 4294901760, %v1022_v16  ;;  %163 = vmatpush.msra.mxu2 %v1016_v14  ;;  %v1047_v26 = vsub.f32 %v34_v12, %v1025_v17 }
   0x7   :  { %15 = vsyncpa [#allocation5], 0  ;;  %v110_v27 = vand.u32 4294901760, %v1028_v18  ;;  %v116_v28 = vand.u32 4294901760, %v1031_v19  ;;  %206 = vmatpush.msra.mxu3 %v989_v4  ;;  %v1063_v32 = vand.u32 4294901760, %v32_v22  ;;  %v122_v33 = vand.u32 4294901760, %v1034_v20 }
   0x8   :  { %v93_v29 = vsub.f32 %v1016_v14, %v92_v23  ;;  %60 = vmatpush.msra.mxu0 %v991_v5  ;;  %v99_v30 = vsub.f32 %v1019_v15, %v98_v24  ;;  %v105_v31 = vsub.f32 %v1022_v16, %v104_v25  ;;  %166 = vmatpush.msra.mxu2 %v1019_v15  ;;  %v128_v34 = vand.u32 4294901760, %v1047_v26  ;;  %v31_v35 = vld [vmem:[%s1397_s1] sm:$0xff]  ;;  %v320_v60 = vld [vmem:[%s1399_s3 + $0x38] sm:$0xff]  ;;  %v319_v61 = vld [vmem:[%s1399_s3 + $0x30] sm:$0xff]  ;;  %s931_s14 = smov [#allocation2]   ;;  %s855_s19 = sshll.u32 %s1404_s8, 4  ;;  %s856_s19 = int_to_ptr.hbm [resolvable:$true] %s855_s19 }
   0x9   :  { %208 = vmatpush.msra.mxu3 %v991_v5  ;;  %v30_v36 = vld [vmem:[%s1396_s0] sm:$0xff]  ;;  %vm45_vm0 = vcmask 654336   ;;  %v111_v39 = vsub.f32 %v1028_v18, %v110_v27  ;;  %v1080_v40 = vsub.f32 %v33_v13, %v1036_v21  ;;  %v117_v41 = vsub.f32 %v1031_v19, %v116_v28  ;;  %v318_v62 = vld [vmem:[%s1399_s3 + $0x28] sm:$0xff]  ;;  %v316_v7 = vld [vmem:[%s1399_s3 + $0x18] sm:$0xff]  ;;  %s842_s15 = sshll.u32 %s931_s14, 4  ;;  %s843_s15 = int_to_ptr.vmem [resolvable:$true] %s842_s15 }
   0xa   :  { %v94_v37 = vand.u32 4294901760, %v93_v29  ;;  %v100_v38 = vand.u32 4294901760, %v99_v30  ;;  %62 = vmatpush.msra.mxu0 %v1002_v9  ;;  %169 = vmatpush.msra.mxu2 %v1022_v16  ;;  %v106_v42 = vand.u32 4294901760, %v105_v31  ;;  %v1087_v43 = vand.u32 4294901760, %v31_v35  ;;  %v317_v6 = vld [vmem:[%s1399_s3 + $0x20] sm:$0xff]  ;;  %v315_v8 = vld [vmem:[%s1399_s3 + $0x10] sm:$0xff] }
   0xb   :  { %210 = vmatpush.msra.mxu3 %v1002_v9  ;;  %v1090_v44 = vsub.f32 %v32_v22, %v1063_v32  ;;  %v47_v45 = vsel %vm45_vm0, %v30_v36, 0  ;;  %v123_v46 = vsub.f32 %v1034_v20, %v122_v33  ;;  %v112_v48 = vand.u32 4294901760, %v111_v39 }
   0xc   :  { %95 = vmatpush.msra.mxu1 %v94_v37  ;;  %64 = vmatpush.msra.mxu0 %v1004_v10  ;;  %v1098_v47 = vand.u32 4294901760, %v47_v45  ;;  %v129_v49 = vsub.f32 %v1047_v26, %v128_v34  ;;  %v134_v50 = vand.u32 4294901760, %v1080_v40  ;;  %v1106_v51 = vsub.f32 %v31_v35, %v1087_v43 }
   0xd   :  { %172 = vmatpush.msra.mxu2 %v1028_v18  ;;  %212 = vmatpush.msra.mxu3 %v1004_v10  ;;  %v140_v52 = vand.u32 4294901760, %v1090_v44  ;;  %v118_v54 = vand.u32 4294901760, %v117_v41  ;;  %v124_v56 = vand.u32 4294901760, %v123_v46  ;;  %v1137_v0 = vand.u32 4294901760, %v320_v60 }
   0xe   :  { %101 = vmatpush.msra.mxu1 %v100_v38  ;;  %66 = vmatpush.msra.mxu0 %v1006_v11  ;;  %v1112_v53 = vsub.f32 %v47_v45, %v1098_v47  ;;  %v130_v57 = vand.u32 4294901760, %v129_v49  ;;  %v135_v58 = vsub.f32 %v1080_v40, %v134_v50  ;;  %v146_v59 = vand.u32 4294901760, %v1106_v51 }
   0xf   :  { %175 = vmatpush.msra.mxu2 %v1031_v19  ;;  %214 = vmatpush.msra.mxu3 %v1006_v11  ;;  %v141_v63 = vsub.f32 %v1090_v44, %v140_v52  ;;  %v1139_v1 = vand.u32 4294901760, %v319_v61  ;;  %v1141_v2 = vand.u32 4294901760, %v318_v62  ;;  %v1154_v13 = vand.u32 4294901760, %v317_v6 }
  0x10   :  { %107 = vmatpush.msra.mxu1 %v106_v42  ;;  %68 = vmatpush.msra.mxu0 %v1025_v17  ;;  %v77_v55 = vand.u32 4294901760, %v1112_v53  ;;  %v1156_v22 = vand.u32 4294901760, %v316_v7  ;;  %v1158_v29 = vand.u32 4294901760, %v315_v8  ;;  %v1163_v30 = vsub.f32 %v320_v60, %v1137_v0 }
  0x11   :  { %178 = vmatpush.msra.mxu2 %v1034_v20  ;;  %216 = vmatpush.msra.mxu3 %v1025_v17  ;;  %v1166_v31 = vsub.f32 %v319_v61, %v1139_v1  ;;  %v1169_v35 = vsub.f32 %v318_v62, %v1141_v2  ;;  %v136_v36 = vand.u32 4294901760, %v135_v58  ;;  %v147_v37 = vsub.f32 %v1106_v51, %v146_v59 }
  0x12   :  { %113 = vmatpush.msra.mxu1 %v112_v48  ;;  %70 = vmatpush.msra.mxu0 %v1036_v21  ;;  %v78_v12 = vsub.f32 %v1112_v53, %v77_v55  ;;  %v1176_v38 = vsub.f32 %v317_v6, %v1154_v13  ;;  %v1179_v39 = vsub.f32 %v316_v7, %v1156_v22  ;;  %v372_v41 = vand.u32 4294901760, %v1163_v30  ;;  %v872_v7 = vld [vmem:[%s1398_s2] ss:$0 sm:$0xff] }
  0x13   :  { %181 = vmatpush.msra.mxu2 %v1047_v26  ;;  %218 = vmatpush.msra.mxu3 %v1036_v21  ;;  %v378_v42 = vand.u32 4294901760, %v1166_v31  ;;  %v384_v45 = vand.u32 4294901760, %v1169_v35  ;;  %v142_v46 = vand.u32 4294901760, %v141_v63  ;;  %v571_v63 = vld [vmem:[%s1401_s5 + $0x18] sm:$0xff]  ;;  %vm325_vm1 = vcmask 523264  }
  0x14   :  { %119 = vmatpush.msra.mxu1 %v118_v54  ;;  %72 = vmatpush.msra.mxu0 %v1063_v32  ;;  %v79_v48 = vand.u32 4294901760, %v78_v12  ;;  %v390_v49 = vand.u32 4294901760, %v1176_v38  ;;  %v1190_v54 = vsub.f32 %v315_v8, %v1158_v29  ;;  %v373_v14 = vsub.f32 %v1163_v30, %v372_v41  ;;  %v569_v8 = vld [vmem:[%s1401_s5 + $0x8] sm:$0xff] }
  0x15   :  { %184 = vmatpush.msra.mxu2 %v1080_v40  ;;  %220 = vmatpush.msra.mxu3 %v1063_v32  ;;  %v396_v58 = vand.u32 4294901760, %v1179_v39 }
  0x16   :  { %125 = vmatpush.msra.mxu1 %v124_v56  ;;  %74 = vmatpush.msra.mxu0 %v1087_v43  ;;  %v148_v56 = vand.u32 4294901760, %v147_v37  ;;  %v374_v15 = vand.u32 4294901760, %v373_v14  ;;  %v391_v60 = vsub.f32 %v1176_v38, %v390_v49  ;;  %v402_v61 = vand.u32 4294901760, %v1190_v54 }
  0x17   :  { %187 = vmatpush.msra.mxu2 %v1090_v44  ;;  %222 = vmatpush.msra.mxu3 %v1087_v43  ;;  %v397_v16 = vsub.f32 %v1179_v39, %v396_v58  ;;  %v573_v44 = vld [vmem:[%s1401_s5 + $0x28] sm:$0xff] }
  0x18   :  { %239 = vmatpush.msrb.mxu0 %v92_v23  ;;  %131 = vmatpush.msra.mxu1 %v130_v57  ;;  %v379_v23 = vsub.f32 %v1166_v31, %v378_v42  ;;  %v385_v57 = vsub.f32 %v1169_v35, %v384_v45 }
  0x19   :  { %190 = vmatpush.msra.mxu2 %v1106_v51  ;;  %226 = vmatmul.f32.vlgmr.msra.gmra.mxu3 %v77_v55  ;;  %v403_v55 = vsub.f32 %v1190_v54, %v402_v61  ;;  %v398_v18 = vand.u32 4294901760, %v397_v16  ;;  %v572_v51 = vld [vmem:[%s1401_s5 + $0x20] sm:$0xff] }
  0x1a   :  { %243 = vmatpush.msrb.mxu0 %v98_v24  ;;  %137 = vmatpush.msra.mxu1 %v136_v36  ;;  %v380_v24 = vand.u32 4294901760, %v379_v23 }
  0x1b   :  { %193 = vmatmul.f32.vlgmr.msra.gmra.mxu2 %v1112_v53  ;;  %80 = vmatmul.f32.vlgmr.msra.gmra.mxu0 %v79_v48  ;;  %v386_v53 = vand.u32 4294901760, %v385_v57 }
  0x1c   :  { %247 = vmatpush.msrb.mxu0 %v104_v25  ;;  %143 = vmatpush.msra.mxu1 %v142_v46  ;;  %v392_v25 = vand.u32 4294901760, %v391_v60 }
  0x1d   :  { %375 = vmatpush.msrb.mxu3 %v374_v15  ;;  %338 = vmatpush.msrb.mxu2 %v1137_v0 }
  0x1e   :  { %251 = vmatpush.msrb.mxu0 %v110_v27  ;;  %149 = vmatpush.msra.mxu1 %v148_v56 }
  0x1f   :  { %151 = vmatmul.f32.vlgmr.msra.gmra.mxu1 %v1098_v47  ;;  %381 = vmatpush.msrb.mxu3 %v380_v24 }
  0x20   :  { %288 = vmatpush.msrb.mxu1 %v987_v3  ;;  %255 = vmatpush.msrb.mxu0 %v116_v28  ;;  %v404_v3 = vand.u32 4294901760, %v403_v55 }
  0x21   :  { %387 = vmatpush.msrb.mxu3 %v386_v53  ;;  %340 = vmatpush.msrb.mxu2 %v1139_v1 }
  0x22   :  { %290 = vmatpush.msrb.mxu1 %v989_v4  ;;  %259 = vmatpush.msrb.mxu0 %v122_v33  ;;  %v314_v4 = vld [vmem:[%s1399_s3 + $0x8] sm:$0xff] }
  0x23   :  { %393 = vmatpush.msrb.mxu3 %v392_v25  ;;  %342 = vmatpush.msrb.mxu2 %v1141_v2 }
  0x24   :  { %292 = vmatpush.msrb.mxu1 %v991_v5  ;;  %263 = vmatpush.msrb.mxu0 %v128_v34  ;;  %v349_v5 = vand.u32 4294901760, %v314_v4  ;;  %v574_v34 = vld [vmem:[%s1401_s5 + $0x30] sm:$0xff] }
  0x25   :  { %399 = vmatpush.msrb.mxu3 %v398_v18  ;;  %344 = vmatpush.msrb.mxu2 %v1154_v13 }
  0x26   :  { %294 = vmatpush.msrb.mxu1 %v1002_v9  ;;  %267 = vmatpush.msrb.mxu0 %v134_v50  ;;  %v313_v9 = vld [vmem:[%s1399_s3] sm:$0xff]  ;;  %v1283_v50 = vand.u32 4294901760, %v573_v44 }
  0x27   :  { %405 = vmatpush.msrb.mxu3 %v404_v3  ;;  %346 = vmatpush.msrb.mxu2 %v1156_v22 }
  0x28   :  { %296 = vmatpush.msrb.mxu1 %v1004_v10  ;;  %271 = vmatpush.msrb.mxu0 %v140_v52  ;;  %v407_v10 = vsub.f32 %v314_v4, %v349_v5  ;;  %v1292_v52 = vsub.f32 %v573_v44, %v1283_v50 }
  0x29   :  { %348 = vmatpush.msrb.mxu2 %v1158_v29 }
  0x2a   :  { %298 = vmatpush.msrb.mxu1 %v1006_v11  ;;  %275 = vmatpush.msrb.mxu0 %v146_v59  ;;  %v351_v11 = vand.u32 4294901760, %v313_v9  ;;  %v1294_v59 = vand.u32 4294901760, %v572_v51  ;;  %v635_v57 = vand.u32 4294901760, %v1292_v52 }
  0x2b   :  { %277 = vmatmul.f32.vlgmr.msrb.gmra.mxu0 %v1098_v47  ;;  %350 = vmatpush.msrb.mxu2 %v349_v5 }
  0x2c   :  { %300 = vmatpush.msrb.mxu1 %v1025_v17  ;;  %503 = vmatpush.msra.mxu0 %v372_v41  ;;  %v408_v17 = vand.u32 4294901760, %v407_v10  ;;  %v413_v19 = vsub.f32 %v313_v9, %v351_v11  ;;  %v1299_v62 = vsub.f32 %v572_v51, %v1294_v59  ;;  %v636_v53 = vsub.f32 %v1292_v52, %v635_v57 }
  0x2d   :  { %352 = vmatpush.msrb.mxu2 %v351_v11 }
  0x2e   :  { %302 = vmatpush.msrb.mxu1 %v1036_v21  ;;  %507 = vmatpush.msra.mxu0 %v378_v42  ;;  %v409_v20 = vsub.f32 %v407_v10, %v408_v17  ;;  %v414_v21 = vand.u32 4294901760, %v413_v19  ;;  %v641_v24 = vand.u32 4294901760, %v1299_v62 }
  0x2f   :  { %433 = vmatpush.msra.mxu2 %v1163_v30 }
  0x30   :  { %304 = vmatpush.msrb.mxu1 %v1063_v32  ;;  %511 = vmatpush.msra.mxu0 %v384_v45  ;;  %v410_v26 = vand.u32 4294901760, %v409_v20  ;;  %v415_v27 = vsub.f32 %v413_v19, %v414_v21  ;;  %v575_v32 = vld [vmem:[%s1401_s5 + $0x38] sm:$0xff]  ;;  %v642_v18 = vsub.f32 %v1299_v62, %v641_v24 }
  0x31   :  { %436 = vmatpush.msra.mxu2 %v1166_v31  ;;  %v1263_v33 = vand.u32 4294901760, %v575_v32 }
  0x32   :  { %306 = vmatpush.msrb.mxu1 %v1087_v43  ;;  %515 = vmatpush.msra.mxu0 %v390_v49  ;;  %v416_v28 = vand.u32 4294901760, %v415_v27  ;;  %v1273_v43 = vand.u32 4294901760, %v574_v34 }
  0x33   :  { %308 = vmatmul.f32.vlgmr.msrb.gmra.mxu1 %v1098_v47  ;;  %439 = vmatpush.msra.mxu2 %v1169_v35  ;;  %v1270_v40 = vsub.f32 %v575_v32, %v1263_v33 }
  0x34   :  { %546 = vmatpush.msra.mxu1 %v1137_v0  ;;  %519 = vmatpush.msra.mxu0 %v396_v58  ;;  %v1281_v47 = vsub.f32 %v574_v34, %v1273_v43 }
  0x35   :  { %411 = vmatpush.msrb.mxu3 %v410_v26  ;;  %442 = vmatpush.msra.mxu2 %v1176_v38  ;;  %v623_v49 = vand.u32 4294901760, %v1270_v40 }
  0x36   :  { %548 = vmatpush.msra.mxu1 %v1139_v1  ;;  %523 = vmatpush.msra.mxu0 %v402_v61 }
  0x37   :  { %417 = vmatpush.msrb.mxu3 %v416_v28  ;;  %445 = vmatpush.msra.mxu2 %v1179_v39  ;;  %v624_v56 = vsub.f32 %v1270_v40, %v623_v49 }
  0x38   :  { %550 = vmatpush.msra.mxu1 %v1141_v2  ;;  %527 = vmatpush.msra.mxu0 %v408_v17  ;;  %v643_v17 = vand.u32 4294901760, %v642_v18 }
  0x39   :  { %470 = vmatpush.msra.mxu3 %v1137_v0  ;;  %448 = vmatpush.msra.mxu2 %v1190_v54  ;;  %v1305_v0 = vand.u32 4294901760, %v571_v63  ;;  %v629_v54 = vand.u32 4294901760, %v1281_v47  ;;  %v625_v61 = vand.u32 4294901760, %v624_v56 }
  0x3a   :  { %552 = vmatpush.msra.mxu1 %v1154_v13  ;;  %531 = vmatpush.msra.mxu0 %v414_v21 }
  0x3b   :  { %472 = vmatpush.msra.mxu3 %v1139_v1  ;;  %451 = vmatpush.msra.mxu2 %v407_v10  ;;  %v570_v1 = vld [vmem:[%s1401_s5 + $0x10] sm:$0xff]  ;;  %v630_v15 = vsub.f32 %v1281_v47, %v629_v54 }
  0x3c   :  { %554 = vmatpush.msra.mxu1 %v1156_v22  ;;  %684 = vmatpush.msrb.mxu0 %v1270_v40  ;;  %v1315_v6 = vand.u32 4294901760, %v570_v1 }
  0x3d   :  { %474 = vmatpush.msra.mxu3 %v1141_v2  ;;  %454 = vmatpush.msra.mxu2 %v413_v19  ;;  %v1312_v2 = vsub.f32 %v571_v63, %v1305_v0  ;;  %v631_v55 = vand.u32 4294901760, %v630_v15 }
  0x3e   :  { %556 = vmatpush.msra.mxu1 %v1158_v29  ;;  %687 = vmatpush.msrb.mxu0 %v1281_v47 }
  0x3f   :  { %476 = vmatpush.msra.mxu3 %v1154_v13  ;;  %v1325_v13 = vsub.f32 %v570_v1, %v1315_v6  ;;  %v647_v16 = vand.u32 4294901760, %v1312_v2 }
  0x40   :  { %558 = vmatpush.msra.mxu1 %v349_v5  ;;  %690 = vmatpush.msrb.mxu0 %v1292_v52 }
  0x41   :  { %478 = vmatpush.msra.mxu3 %v1156_v22  ;;  %v1328_v22 = vand.u32 4294901760, %v569_v8  ;;  %v653_v3 = vand.u32 4294901760, %v1325_v13  ;;  %v648_v9 = vsub.f32 %v1312_v2, %v647_v16 }
  0x42   :  { %560 = vmatpush.msra.mxu1 %v351_v11  ;;  %693 = vmatpush.msrb.mxu0 %v1299_v62 }
  0x43   :  { %480 = vmatpush.msra.mxu3 %v1158_v29  ;;  %v568_v29 = vld [vmem:[%s1401_s5] sm:$0xff]  ;;  %v1335_v30 = vsub.f32 %v569_v8, %v1328_v22  ;;  %v654_v19 = vsub.f32 %v1325_v13, %v653_v3  ;;  %v649_v26 = vand.u32 4294901760, %v648_v9 }
  0x44   :  { %721 = vmatpush.msrb.mxu1 %v1263_v33  ;;  %696 = vmatpush.msrb.mxu0 %v1312_v2  ;;  %v1338_v31 = vand.u32 4294901760, %v568_v29 }
  0x45   :  { %482 = vmatpush.msra.mxu3 %v349_v5  ;;  %v637_v5 = vand.u32 4294901760, %v636_v53  ;;  %v659_v10 = vand.u32 4294901760, %v1335_v30  ;;  %v655_v32 = vand.u32 4294901760, %v654_v19 }
  0x46   :  { %723 = vmatpush.msrb.mxu1 %v1273_v43  ;;  %699 = vmatpush.msrb.mxu0 %v1325_v13  ;;  %v1342_v37 = vsub.f32 %v568_v29, %v1338_v31 }
  0x47   :  { %484 = vmatpush.msra.mxu3 %v351_v11  ;;  %v660_v27 = vsub.f32 %v1335_v30, %v659_v10 }
  0x48   :  { %725 = vmatpush.msrb.mxu1 %v1283_v50  ;;  %702 = vmatpush.msrb.mxu0 %v1335_v30  ;;  %v665_v20 = vand.u32 4294901760, %v1342_v37 }
  0x49   :  { %v661_v40 = vand.u32 4294901760, %v660_v27 }
  0x4a   :  { %727 = vmatpush.msrb.mxu1 %v1294_v59  ;;  %705 = vmatpush.msrb.mxu0 %v1342_v37  ;;  %v666_v34 = vsub.f32 %v1342_v37, %v665_v20 }
  0x4c   :  { %729 = vmatpush.msrb.mxu1 %v1305_v0  ;;  %v667_v44 = vand.u32 4294901760, %v666_v34 }
  0x4e   :  { %731 = vmatpush.msrb.mxu1 %v1315_v6 }
  0x50   :  { %733 = vmatpush.msrb.mxu1 %v1328_v22 }
  0x52   :  { %735 = vmatpush.msrb.mxu1 %v1338_v31 }
  0x98   :  { %v81_v12 = vpop.f32.mrf.mxu0 }
  0x99   :  { %v82_v35 = vadd.f32 %v872_v7, %v81_v12 }
  0x9c   :  { %v152_v36 = vpop.f32.mrf.mxu1  ;;  %v227_v42 = vpop.f32.mrf.mxu3 }
  0x9d   :  { %v153_v38 = vadd.f32 %v152_v36, %v82_v35 }
  0x9e   :  { %v194_v39 = vpop.f32.mrf.mxu2 }
  0x9f   :  { %v195_v41 = vadd.f32 %v194_v39, %v153_v38 }
  0xa1   :  { %v228_v45 = vadd.f32 %v227_v42, %v195_v41 }
  0xa8   :  { %v278_v46 = vpop.f32.mrf.mxu0 }
  0xa9   :  { %v279_v48 = vadd.f32 %v278_v46, %v228_v45 }
  0xb0   :  { %v309_v14 = vpop.f32.mrf.mxu1 }
  0xb1   :  { %v310_v23 = vadd.f32 %v309_v14, %v279_v48 }
  0xb3   :  { %v312_v58 = vmax.f32 %v310_v23, 0.0 }
  0xb5   :  { %v327_v60 = vsel %vm325_vm1, %v312_v58, 0 }
  0xb6   :  { %v353_v25 = vand.u32 4294901760, %v327_v60 }
  0xb8   :  { %v354_v4 = vsub.f32 %v327_v60, %v353_v25  ;;  %419 = vmatmul.f32.vlgmr.msrb.gmra.mxu3 %v353_v25  ;;  %533 = vmatmul.f32.vlgmr.msra.gmra.mxu0 %v353_v25 }
  0xb9   :  { %562 = vmatmul.f32.vlgmr.msra.gmra.mxu1 %v353_v25  ;;  %626 = vmatpush.msrb.mxu3 %v625_v61 }
  0xba   :  { %v355_v11 = vand.u32 4294901760, %v354_v4 }
  0xbb   :  { %632 = vmatpush.msrb.mxu3 %v631_v55 }
  0xbc   :  { %v356_v21 = vsub.f32 %v354_v4, %v355_v11 }
  0xbd   :  { %638 = vmatpush.msrb.mxu3 %v637_v5 }
  0xbe   :  { %v357_v28 = vand.u32 4294901760, %v356_v21 }
  0xbf   :  { %644 = vmatpush.msrb.mxu3 %v643_v17 }
  0xc0   :  { %358 = vmatmul.f32.vlgmr.msrb.gmra.mxu2 %v357_v28  ;;  %488 = vmatmul.f32.vlgmr.msra.gmra.mxu3 %v355_v11 }
  0xc1   :  { %589 = vmatpush.msrb.mxu2 %v1263_v33  ;;  %650 = vmatpush.msrb.mxu3 %v649_v26 }
  0xc2   :  { %708 = vmatmul.f32.vlgmr.msrb.gmra.mxu0 %v354_v4  ;;  %739 = vmatmul.f32.vlgmr.msrb.gmra.mxu1 %v355_v11 }
  0xc3   :  { %591 = vmatpush.msrb.mxu2 %v1273_v43  ;;  %656 = vmatpush.msrb.mxu3 %v655_v32 }
  0xc5   :  { %593 = vmatpush.msrb.mxu2 %v1283_v50  ;;  %662 = vmatpush.msrb.mxu3 %v661_v40 }
  0xc7   :  { %595 = vmatpush.msrb.mxu2 %v1294_v59  ;;  %668 = vmatpush.msrb.mxu3 %v667_v44 }
  0xc8   :  { %457 = vmatmul.f32.vlgmr.msra.gmra.mxu2 %v354_v4  ;;  %670 = vmatmul.f32.vlgmr.msrb.gmra.mxu3 %v353_v25 }
  0xc9   :  { %797 = vmatpush.msra.mxu3 %v1263_v33  ;;  %597 = vmatpush.msrb.mxu2 %v1305_v0  ;;  %v873_v33 = vld [vmem:[%s1400_s4] ss:$0 sm:$0xff]  ;;  %s844_s4 = sshll.u32 %s1403_s7, 4  ;;  %s845_s4 = int_to_ptr.hbm [resolvable:$true] %s844_s4 }
  0xcb   :  { %799 = vmatpush.msra.mxu3 %v1273_v43  ;;  %599 = vmatpush.msrb.mxu2 %v1315_v6 }
  0xcd   :  { %801 = vmatpush.msra.mxu3 %v1283_v50  ;;  %601 = vmatpush.msrb.mxu2 %v1328_v22 }
  0xcf   :  { %803 = vmatpush.msra.mxu3 %v1294_v59  ;;  %603 = vmatpush.msrb.mxu2 %v1338_v31 }
  0xd0   :  { %609 = vmatmul.f32.vlgmr.msrb.gmra.mxu2 %v357_v28 }
  0xd1   :  { %754 = vmatpush.msra.mxu2 %v623_v49  ;;  %805 = vmatpush.msra.mxu3 %v1305_v0 }
  0xd3   :  { %758 = vmatpush.msra.mxu2 %v629_v54  ;;  %807 = vmatpush.msra.mxu3 %v1315_v6  ;;  %v874_v6 = vld [vmem:[%s1402_s6] ss:$0 sm:$0xff]  ;;  %s932_s6 = smov [#allocation4]  }
  0xd4   :  { %s853_s7 = sshll.u32 %s932_s6, 4  ;;  %s854_s7 = int_to_ptr.vmem [resolvable:$true] %s853_s7 }
  0xd5   :  { %762 = vmatpush.msra.mxu2 %v635_v57  ;;  %809 = vmatpush.msra.mxu3 %v1328_v22 }
  0xd7   :  { %766 = vmatpush.msra.mxu2 %v641_v24  ;;  %811 = vmatpush.msra.mxu3 %v1338_v31 }
  0xd8   :  { %813 = vmatmul.f32.vlgmr.msra.gmra.mxu3 %v353_v25 }
  0xd9   :  { %770 = vmatpush.msra.mxu2 %v647_v16 }
  0xdb   :  { %774 = vmatpush.msra.mxu2 %v653_v3 }
  0xdd   :  { %778 = vmatpush.msra.mxu2 %v659_v10 }
  0xdf   :  { %782 = vmatpush.msra.mxu2 %v665_v20 }
  0xe0   :  { %784 = vmatmul.f32.vlgmr.msra.gmra.mxu2 %v353_v25 }
 0x135   :  { %v534_v0 = vpop.f32.mrf.mxu0 }
 0x136   :  { %v563_v2 = vpop.f32.mrf.mxu1 }
 0x13b   :  { %v420_v43 = vpop.f32.mrf.mxu3 }
 0x13f   :  { %v709_v30 = vpop.f32.mrf.mxu0  ;;  %v740_v35 = vpop.f32.mrf.mxu1 }
 0x143   :  { %v359_v47 = vpop.f32.mrf.mxu2  ;;  %v489_v62 = vpop.f32.mrf.mxu3 }
 0x144   :  { %v360_v50 = vadd.f32 %v873_v33, %v359_v47 }
 0x146   :  { %v421_v51 = vadd.f32 %v420_v43, %v360_v50 }
 0x14b   :  { %v458_v52 = vpop.f32.mrf.mxu2  ;;  %v671_v22 = vpop.f32.mrf.mxu3 }
 0x14c   :  { %v459_v59 = vadd.f32 %v458_v52, %v421_v51 }
 0x14e   :  { %v490_v63 = vadd.f32 %v489_v62, %v459_v59 }
 0x150   :  { %v535_v1 = vadd.f32 %v534_v0, %v490_v63 }
 0x152   :  { %v564_v7 = vadd.f32 %v563_v2, %v535_v1 }
 0x153   :  { %v610_v8 = vpop.f32.mrf.mxu2 }
 0x154   :  { %v566_v12 = vmax.f32 %v564_v7, 0.0  ;;  %v611_v13 = vadd.f32 %v874_v6, %v610_v8 }
 0x156   :  { %567 = vst.msk [vmem:[#allocation2] sm:$0xff] %vm45_vm0, %v566_v12  ;;  %v672_v29 = vadd.f32 %v671_v22, %v611_v13 }
 0x157   :  { %847 = dma.vmem_to_hbm [thread:$0]  %s843_s15, 128, %s845_s4, [#allocation3]  }
 0x158   :  { %v710_v31 = vadd.f32 %v709_v30, %v672_v29 }
 0x15a   :  { %v741_v36 = vadd.f32 %v740_v35, %v710_v31 }
 0x15b   :  { %v814_v39 = vpop.f32.mrf.mxu3 }
 0x163   :  { %v785_v37 = vpop.f32.mrf.mxu2 }
 0x164   :  { %v786_v38 = vadd.f32 %v785_v37, %v741_v36 }
 0x166   :  { %v815_v41 = vadd.f32 %v814_v39, %v786_v38 }
 0x168   :  { %v869_v42 = vmul.f32 -1.442695, %v815_v41 }
 0x16a   :  { %875 = vpow2.f32 %v869_v42 }
 0x170   :  { %v876_v45 = vpop.eup %875 }
 0x171   :  { %v820_v46 = vadd.f32 1.0, %v876_v45 }
 0x173   :  { %877 = vrcp.f32 %v820_v46  ;;  %v832_v14 = vand.u32 2147483648, %v820_v46  ;;  %v830_v56 = vand.u32 2147483647, %v820_v46  ;;  %vm826_vm3 = vweird.f32 %v820_v46 }
 0x175   :  { %v833_v58 = vor.u32 1.1754944e-38, %v832_v14  ;;  %vm831_vm5 = vcmp.eq.f32.partialorder %v830_v56, 8.507059e+37 }
 0x179   :  { %v878_v48 = vpop.eup %877 }
 0x17a   :  { %v822_v49 = vmul.f32 %v878_v48, %v820_v46  ;;  %vm827_vm2 = vweird.f32 %v878_v48 }
 0x17b   :  { %vm828_vm4 = vmor %vm826_vm3, %vm827_vm2 }
 0x17c   :  { %v823_v54 = vsub.f32 1.0, %v822_v49 }
 0x17e   :  { %v824_v23 = vmul.f32 %v878_v48, %v823_v54 }
 0x180   :  { %v825_v57 = vadd.f32 %v878_v48, %v824_v23 }
 0x182   :  { %v829_v15 = vsel %vm828_vm4, %v878_v48, %v825_v57 }
 0x183   :  { %v834_v24 = vsel %vm831_vm5, %v833_v58, %v829_v15 }
 0x184   :  { %836 = vst.msk [vmem:[#allocation4] sm:$0xff] %vm45_vm0, %v834_v24 }
 0x185   :  { %858 = dma.vmem_to_hbm [thread:$0]  %s854_s7, 128, %s856_s19, [#allocation5]  }
 0x186   :  { %927 = dma.done.wait [#allocation3], 128  }
 0x187   :  { %928 = vsyncadd [#allocation3], 4294967168 }
 0x188   :  { %929 = dma.done.wait [#allocation5], 128  }
 0x189   :  { %930 = vsyncadd [#allocation5], 4294967168 }
 0x18a   :  { %867 = vsyncpa [#allocation3], 1 }
 0x18b   :  { %868 = vsyncpa [#allocation5], 1 }

</bundles_post_ra>
